<compile_context>
chip_gen: v5e
topology: v5e:2x2
jax: 0.10.0
libtpu: 0.0.40
codegen_flags: <defaults>
</compile_context>

<pallas_src>
import functools

import jax
import jax.numpy as jnp
from jax.experimental import pallas as pl
from jax.experimental.pallas import tpu as pltpu

_NEG_BIG = -1.0e30  # padded-class bias: exp(underflow) == 0, never wins the max


# --------------------------------------------------------------------------- #
# Kernel
# --------------------------------------------------------------------------- #
def _classifier_kernel(x_ref, w_ref, b_ref, *refs, compute_prob):
    """One (batch-tile, K-tile) grid step of: logits = x_flat @ w_eff + b_eff.

    x_ref:   (TB, TK)     flattened NCHW activations (cast to w dtype in-kernel)
    w_ref:   (TK, O_pad)  pool-folded weight (bf16), zero-padded class columns
    b_ref:   (1,  O_pad)  f32 bias; padded entries = -1e30
    outs:    logits (TB, O_pad) f32  [+ max softmax prob (TB, 1) when B == 1]
    scratch: f32 accumulator (TB, O_pad), persists across the K grid axis
    """
    if compute_prob:
        logits_ref, prob_ref, acc_ref = refs
    else:
        logits_ref, acc_ref = refs

    k = pl.program_id(1)

    @pl.when(k == 0)
    def _init():
        acc_ref[...] = jnp.zeros_like(acc_ref)

    # Dropout(p=1-cost) is the identity in eval mode -> nothing to apply.
    # TODO(synk): training-mode stochastic dropout masking not implemented.
    # bf16 MXU matmul with f32 accumulation.
    acc_ref[...] += jnp.dot(
        x_ref[...].astype(w_ref.dtype), w_ref[...],
        preferred_element_type=jnp.float32)

    @pl.when(k == pl.num_programs(1) - 1)
    def _finalize():
        logits = acc_ref[...] + b_ref[...]
        logits_ref[...] = logits.astype(logits_ref.dtype)
        if compute_prob:
            # max softmax prob = 1 / sum(exp(logits - max)).  Exact reciprocal:
            # the approx EUP reciprocal could flip the stop decision when the
            # true max prob sits near the threshold (B == 1 path only, cheap).
            m = jnp.max(logits, axis=1, keepdims=True)
            s = jnp.sum(jnp.exp(logits - m), axis=1, keepdims=True)
            prob_ref[...] = (1.0 / s).astype(prob_ref.dtype)


# --------------------------------------------------------------------------- #
# One-time parameter preparation (cached by PallasClassifier)
# --------------------------------------------------------------------------- #
def _fold_pool_into_linear(weight, bias, *, pool, c, h, w, compute_dtype):
    """Fold AvgPool2d(pool) into the linear weight.  Runs ONCE per input shape.

    Returns:
      w_eff: (C*H*W, O_pad) compute_dtype, so x.reshape(B,-1) @ w_eff equals
             linear(avg_pool(x)) for the real class columns.
      b_eff: (1, O_pad) f32 bias; padded class columns hold _NEG_BIG.
    """
    o = int(weight.shape[0])
    hp, wp = h // pool, w // pool
    assert weight.shape[1] == c * hp * wp, (
        "Linear in_features must equal C * (H//pool) * (W//pool)")
    o_pad = ((o + 127) // 128) * 128

    w_t = jnp.transpose(weight.astype(jnp.float32)).reshape(c, hp, wp, o)
    w_core = jnp.broadcast_to(
        w_t[:, :, None, :, None, :], (c, hp, pool, wp, pool, o)
    ).reshape(c, hp * pool, wp * pool, o) * (1.0 / (pool * pool))
    # AvgPool2d floor-crops any H/W remainder: those input positions get weight 0.
    w_full = jnp.pad(
        w_core, ((0, 0), (0, h - hp * pool), (0, w - wp * pool), (0, 0)))
    w_eff = w_full.reshape(c * h * w, o)
    w_eff = jnp.pad(w_eff, ((0, 0), (0, o_pad - o))).astype(compute_dtype)

    b_eff = jnp.pad(bias.astype(jnp.float32), (0, o_pad - o),
                    constant_values=_NEG_BIG).reshape(1, o_pad)
    return w_eff, b_eff


# --------------------------------------------------------------------------- #
# Tile / VMEM planning (pure Python, from static shapes)
# --------------------------------------------------------------------------- #
def _plan_tiles(B, D, o_pad, *, x_itemsize, w_itemsize):
    """Pick (batch tile TB, reduction tile TK, vmem_limit_bytes).

    Counts every resident buffer (the grid-invariant weight block is
    conservatively counted double-buffered instead of relying on
    pipeline_mode tricks); falls back to K-tiling when the weight would not
    fit half the budget (important on v7x: 64 MiB VMEM per TensorCore).
    """
    try:
        phys_vmem = int(pltpu.get_tpu_info().vmem_capacity_bytes)
    except Exception:  # fall back to the smallest current chip (v7x: 64 MiB/TC)
        phys_vmem = 64 * 1024 * 1024
    total_budget = min(phys_vmem // 2, 32 * 1024 * 1024)

    # ---- reduction (K) tile: keep double-buffered weight under half budget.
    weight_budget = total_budget // 2
    tk = D
    if 2 * D * o_pad * w_itemsize > weight_budget and D % 128 == 0:
        tk = 128
        t = 256
        while t <= D:
            if D % t == 0 and 2 * t * o_pad * w_itemsize <= weight_budget:
                tk = t
            t += 128
    # (If D is not a multiple of 128 we keep tk == D and rely on vmem_limit.)

    # ---- batch tile from what is left.
    resident = 2 * tk * o_pad * w_itemsize + 2 * o_pad * 4      # weight + bias
    remaining = max(total_budget - resident, 2 * 1024 * 1024)
    per_row = 2 * tk * x_itemsize + 3 * o_pad * 4  # 2 x bufs + 2 out bufs + acc
    tb_max = max(8, (remaining // per_row) // 8 * 8)

    if B <= tb_max and B < 16:
        tb = B                                     # single full-batch tile
    else:
        nb = -(-B // tb_max)
        if B >= 16:
            nb = max(nb, 2)    # >= 2 grid steps so both v7x TensorCores get work
        tb = ((-(-B // nb) + 7) // 8) * 8          # balanced, sublane-aligned
        if tb >= B:
            tb = B

    est = (2 * tb * tk * x_itemsize        # x (double buffered)
           + 2 * tk * o_pad * w_itemsize   # weight (counted double buffered)
           + 2 * o_pad * 4                 # bias
           + 2 * tb * o_pad * 4            # logits out (double buffered)
           + tb * o_pad * 4                # f32 accumulator scratch
           + 2 * tb * 4)                   # prob out (B == 1 path only)
    vmem_limit = max(32 * 1024 * 1024, est + 4 * 1024 * 1024)
    vmem_limit = min(vmem_limit,
                     max(phys_vmem - 2 * 1024 * 1024, 32 * 1024 * 1024))
    return int(tb), int(tk), int(vmem_limit)


# --------------------------------------------------------------------------- #
# pallas_call construction + jitted forward
# --------------------------------------------------------------------------- #
def _make_pallas_call(B, D, o_pad, tb, tk, x_dtype, w_dtype, compute_prob,
                      vmem_limit_bytes):
    nb = pl.cdiv(B, tb)
    nk = D // tk
    x_bytes = jnp.dtype(x_dtype).itemsize
    w_bytes = jnp.dtype(w_dtype).itemsize

    out_shape = [jax.ShapeDtypeStruct((B, o_pad), jnp.float32)]
    out_specs = [pl.BlockSpec((tb, o_pad), lambda i, k: (i, 0))]
    if compute_prob:
        out_shape.append(jax.ShapeDtypeStruct((B, 1), jnp.float32))
        out_specs.append(pl.BlockSpec((tb, 1), lambda i, k: (i, 0)))

    cost = pl.CostEstimate(
        flops=2 * B * D * o_pad,
        transcendentals=(B * o_pad if compute_prob else 0),
        bytes_accessed=(B * D * x_bytes
                        + (nb if nk > 1 else 1) * D * o_pad * w_bytes
                        + B * o_pad * 4))

    return pl.pallas_call(
        functools.partial(_classifier_kernel, compute_prob=compute_prob),
        grid=(nb, nk),
        out_shape=tuple(out_shape),
        in_specs=[
            # x streams over (batch, reduction), double buffered by the pipeline.
            pl.BlockSpec((tb, tk), lambda i, k: (i, k)),
            # Folded weight: when nk == 1 its block index never changes, so the
            # pipeline fetches it once and keeps it resident across batch tiles.
            pl.BlockSpec((tk, o_pad), lambda i, k: (k, 0)),
            pl.BlockSpec((1, o_pad), lambda i, k: (0, 0)),
        ],
        out_specs=tuple(out_specs),
        scratch_shapes=[pltpu.VMEM((tb, o_pad), jnp.float32)],
        compiler_params=pltpu.CompilerParams(
            dimension_semantics=("parallel", "arbitrary"),
            vmem_limit_bytes=int(vmem_limit_bytes),
        ),
        cost_estimate=cost,
    )


@functools.partial(
    jax.jit,
    static_argnames=("tb", "tk", "o", "o_pad", "compute_prob",
                     "return_padded", "vmem_limit_bytes"))
def _classifier_forward_jit(x, w_eff, b_eff, stop_threshold, *, tb, tk, o,
                            o_pad, compute_prob, return_padded,
                            vmem_limit_bytes):
    B = x.shape[0]
    x_flat = x.reshape(B, -1)           # contiguous NCHW reshape: free
    D = x_flat.shape[1]

    call = _make_pallas_call(B, D, o_pad, tb, tk, x_flat.dtype, w_eff.dtype,
                             compute_prob, vmem_limit_bytes)
    outs = call(x_flat, w_eff, b_eff)
    logits_padded = outs[0]

    # Padded class columns hold ~-1e30 (from the padded bias).  Either slice
    # them away (default, matches the PyTorch output shape) or hand the padded
    # lane-dense tensor straight to the consumer (return_padded=True) and skip
    # the extra output-sized HBM round trip of the slice.
    logits = logits_padded if return_padded else logits_padded[:, :o]

    if compute_prob:
        stopped = outs[1][0, 0] >= stop_threshold
    else:
        stopped = jnp.zeros((), dtype=jnp.bool_)   # batch > 1 never early-stops
    return logits, stopped


# --------------------------------------------------------------------------- #
# Module-like wrapper
# --------------------------------------------------------------------------- #
class PallasClassifier:
    """Pallas TPU port of the PyTorch `Classifier` (inference / eval mode).

    Weight/bias use the PyTorch Linear layout: weight (out_classes, in_modules),
    bias (out_classes,), with in_modules == C * (H // pool) * (W // pool).
    """

    def __init__(self, weight, bias, *, pool=4, cost=0.0, stop_threshold=0.75,
                 compute_dtype=jnp.bfloat16):
        del cost  # Dropout(p=1-cost) is the identity in eval mode.
        self.weight = jnp.asarray(weight)
        self.bias = jnp.asarray(bias)
        self.pool = int(pool)
        self.stop_threshold = float(stop_threshold)
        self.compute_dtype = compute_dtype
        self.out_classes = int(self.weight.shape[0])
        self.stopped = 0
        self._folded = {}   # (C, H, W) -> (w_eff, b_eff); built once, reused.

    def reset(self):
        self.stopped = 0

    def _folded_params(self, c, h, w):
        key = (c, h, w)
        if key not in self._folded:     # one-time prep, cached across calls
            self._folded[key] = _fold_pool_into_linear(
                self.weight, self.bias, pool=self.pool, c=c, h=h, w=w,
                compute_dtype=self.compute_dtype)
        return self._folded[key]

    def __call__(self, x, stop_threshold=None, *, return_padded=False):
        thr = self.stop_threshold if stop_threshold is None else float(stop_threshold)
        x = jnp.asarray(x)
        B, C, H, W = x.shape
        w_eff, b_eff = self._folded_params(C, H, W)
        D, o_pad = int(w_eff.shape[0]), int(w_eff.shape[1])

        tb, tk, vmem_limit = _plan_tiles(
            B, D, o_pad,
            x_itemsize=jnp.dtype(x.dtype).itemsize,
            w_itemsize=jnp.dtype(w_eff.dtype).itemsize)

        logits, stopped = _classifier_forward_jit(
            x, w_eff, b_eff, jnp.float32(thr),
            tb=tb, tk=tk, o=self.out_classes, o_pad=o_pad,
            compute_prob=(B == 1), return_padded=return_padded,
            vmem_limit_bytes=vmem_limit)

        # `stopped` is a device bool scalar for every batch size (no forced
        # host sync here); callers decide when to block.
        # TODO(synk): the PyTorch `self.stopped += stopped` counter needs a host
        # sync (bool(stopped)); left to the caller.
        return logits, stopped


# --------------------------------------------------------------------------- #
# Self-test
# --------------------------------------------------------------------------- #
if __name__ == "__main__":
    # Shapes consistent with the module: batch=2, channels=4, spatial=16,
    # pool=4 -> in_modules = 4 * (16/4) * (16/4) = 64, out_classes = 10.
    B, C, H, W = 2, 4, 16, 16
    POOL = 4
    IN_MODULES = C * (H // POOL) * (W // POOL)
    OUT_CLASSES = 10

    key = jax.random.PRNGKey(0)
    kx, kw, kb = jax.random.split(key, 3)

    x = jax.random.normal(kx, (B, C, H, W), dtype=jnp.float32)
    bound = 1.0 / (IN_MODULES ** 0.5)
    w = jax.random.uniform(kw, (OUT_CLASSES, IN_MODULES),
                           minval=-bound, maxval=bound, dtype=jnp.float32)
    b = jax.random.uniform(kb, (OUT_CLASSES,),
                           minval=-bound, maxval=bound, dtype=jnp.float32)

    clf = PallasClassifier(w, b, pool=POOL)

    # Pure-JAX f32 reference (the module spec).
    pooled_ref = jnp.mean(
        x.reshape(B, C, H // POOL, POOL, W // POOL, POOL), axis=(3, 5)
    ).reshape(B, -1)
    logits_ref = pooled_ref @ w.T + b

    # ---- batch > 1 path (no softmax/prob output emitted) ----
    logits, stopped = clf(x)
    logits = jax.block_until_ready(logits)
    assert logits.shape == (B, OUT_CLASSES)
    assert jnp.allclose(logits, logits_ref, atol=3e-2, rtol=3e-2)  # bf16 matmul
    assert not bool(stopped)     # batch != 1 -> never stops, like PyTorch

    # ---- batch == 1 path (early-stop decision computed on device) ----
    logits1, stopped1 = clf(x[:1])
    logits1 = jax.block_until_ready(logits1)
    assert jnp.allclose(logits1, logits_ref[:1], atol=3e-2, rtol=3e-2)
    sm_ref = jax.nn.softmax(logits_ref[:1], axis=1)
    expected_stop = bool(jnp.max(sm_ref) >= 0.75)
    assert bool(stopped1) == expected_stop

    # ---- repeated call: cached folded weight, no per-call weight rebuild ----
    logits2, _ = clf(x)
    jax.block_until_ready(logits2)
    assert jnp.allclose(logits2, logits, atol=0.0, rtol=0.0)

    print("KERNEL_OK")
</pallas_src>

<mosaic_0001>
module attributes {stable_mosaic.version = 11 : i64} {
  func.func @_classifier_kernel(%arg0: i32, %arg1: i32, %arg2: memref<2x1024xf32, #tpu.memory_space<vmem>>, %arg3: memref<1024x128xbf16, #tpu.memory_space<vmem>>, %arg4: memref<1x128xf32, #tpu.memory_space<vmem>>, %arg5: memref<2x128xf32, #tpu.memory_space<vmem>>, %arg6: memref<2x128xf32, #tpu.memory_space<vmem>>) attributes {dimension_semantics = [#tpu.dimension_semantics<parallel>, #tpu.dimension_semantics<arbitrary>], iteration_bounds = array<i64: 1, 1>, scalar_prefetch = 0 : i64, scratch_operands = 1 : i64, tpu.core_type = #tpu.core_type<tc>, window_params = [{transform_indices = @transform_0, window_bounds = array<i64: 2, 1024>}, {transform_indices = @transform_1, window_bounds = array<i64: 1024, 128>}, {pipeline_mode = #tpu.pipeline_mode<synchronous>, transform_indices = @transform_2, window_bounds = array<i64: 1, 128>}, {transform_indices = @transform_3, window_bounds = array<i64: 2, 128>}]} {
    %c0_i32 = arith.constant 0 : i32
    %0 = arith.cmpi eq, %arg1, %c0_i32 : i32
    %1 = arith.extui %0 : i1 to i32
    %c0_i32_0 = arith.constant 0 : i32
    %2 = arith.cmpi ne, %1, %c0_i32_0 : i32
    scf.if %2 {
      %cst_10 = arith.constant 0.000000e+00 : f32
      %13 = vector.broadcast %cst_10 : f32 to vector<2x128xf32>
      %c0_11 = arith.constant 0 : index
      %c0_12 = arith.constant 0 : index
      %14 = vector.load %arg6[%c0_11, %c0_12] : memref<2x128xf32, #tpu.memory_space<vmem>>, vector<2x128xf32>
      tpu.vector_store %arg6[%c0_11, %c0_12], %13 {strides = array<i32>} : memref<2x128xf32, #tpu.memory_space<vmem>>, vector<2x128xf32>,
    } else {
    }
    %c0 = arith.constant 0 : index
    %c0_1 = arith.constant 0 : index
    %3 = vector.load %arg6[%c0, %c0_1] : memref<2x128xf32, #tpu.memory_space<vmem>>, vector<2x128xf32>
    %c0_2 = arith.constant 0 : index
    %c0_3 = arith.constant 0 : index
    %4 = vector.load %arg2[%c0_2, %c0_3] : memref<2x1024xf32, #tpu.memory_space<vmem>>, vector<2x1024xf32>
    %5 = arith.truncf %4 : vector<2x1024xf32> to vector<2x1024xbf16>
    %c0_4 = arith.constant 0 : index
    %c0_5 = arith.constant 0 : index
    %6 = vector.load %arg3[%c0_4, %c0_5] : memref<1024x128xbf16, #tpu.memory_space<vmem>>, vector<1024x128xbf16>
    %cst = arith.constant dense<0.000000e+00> : vector<2x128xf32>
    %7 = tpu.matmul %5, %6, %cst {dimension_numbers = #tpu.dot_dimension_numbers<[1], [0], [0], [1], [0, 0, 1, 1], [], []>} : vector<2x1024xbf16>, vector<1024x128xbf16>, vector<2x128xf32> -> vector<2x128xf32>
    %8 = arith.addf %3, %7 : vector<2x128xf32>
    %c0_6 = arith.constant 0 : index
    %c0_7 = arith.constant 0 : index
    %9 = vector.load %arg6[%c0_6, %c0_7] : memref<2x128xf32, #tpu.memory_space<vmem>>, vector<2x128xf32>
    tpu.vector_store %arg6[%c0_6, %c0_7], %8 {strides = array<i32>} : memref<2x128xf32, #tpu.memory_space<vmem>>, vector<2x128xf32>,
    %c0_i32_8 = arith.constant 0 : i32
    %10 = arith.cmpi eq, %arg1, %c0_i32_8 : i32
    %11 = arith.extui %10 : i1 to i32
    %c0_i32_9 = arith.constant 0 : i32
    %12 = arith.cmpi ne, %11, %c0_i32_9 : i32
    scf.if %12 {
      %c0_10 = arith.constant 0 : index
      %c0_11 = arith.constant 0 : index
      %13 = vector.load %arg6[%c0_10, %c0_11] : memref<2x128xf32, #tpu.memory_space<vmem>>, vector<2x128xf32>
      %c0_12 = arith.constant 0 : index
      %c0_13 = arith.constant 0 : index
      %14 = vector.load %arg4[%c0_12, %c0_13] : memref<1x128xf32, #tpu.memory_space<vmem>>, vector<1x128xf32>
      %15 = vector.broadcast %14 : vector<1x128xf32> to vector<2x128xf32>
      %16 = arith.addf %13, %15 : vector<2x128xf32>
      %c0_14 = arith.constant 0 : index
      %c0_15 = arith.constant 0 : index
      %17 = vector.load %arg5[%c0_14, %c0_15] : memref<2x128xf32, #tpu.memory_space<vmem>>, vector<2x128xf32>
      tpu.vector_store %arg5[%c0_14, %c0_15], %16 {strides = array<i32>} : memref<2x128xf32, #tpu.memory_space<vmem>>, vector<2x128xf32>,
    } else {
    }
    return
  }
  func.func @transform_0(%arg0: i32, %arg1: i32) -> (i32, i32) {
    %c0_i32 = arith.constant 0 : i32
    return %arg0, %arg1 : i32, i32
  }
  func.func @transform_1(%arg0: i32, %arg1: i32) -> (i32, i32) {
    %c0_i32 = arith.constant 0 : i32
    %c0_i32_0 = arith.constant 0 : i32
    return %arg1, %c0_i32 : i32, i32
  }
  func.func @transform_2(%arg0: i32, %arg1: i32) -> (i32, i32) {
    %c0_i32 = arith.constant 0 : i32
    %c0_i32_0 = arith.constant 0 : i32
    %c0_i32_1 = arith.constant 0 : i32
    return %c0_i32, %c0_i32_0 : i32, i32
  }
  func.func @transform_3(%arg0: i32, %arg1: i32) -> (i32, i32) {
    %c0_i32 = arith.constant 0 : i32
    %c0_i32_0 = arith.constant 0 : i32
    return %arg0, %c0_i32 : i32, i32
  }
}

</mosaic_0001>

<bundles_post_ra>
// kernel: _classifier_forward_jit.1
= control target key start
LH: loop header
LB: loop body
LE: loop exit
PB: predicated region body
PF: predicated region fallthrough
CT: control target
= control target key end

     0   :  { %8 = vsyncpa [#allocation4], 0  ;;  %s1131_s0 = inlined_call_operand.vmem [shape: f32[2,1024], index: 0, kind: input, shape index: {}]   ;;  %s1132_s1 = inlined_call_operand.hbm [shape: bf16[1024,128], index: 1, kind: input, shape index: {}]   ;;  %s1133_s2 = inlined_call_operand.vmem [shape: f32[1,128], index: 2, kind: input, shape index: {}]   ;;  %s1134_s3 = inlined_call_operand.hbm [shape: f32[2,128], index: 3, kind: output, shape index: {}]  }
   0x1   :  { %9 = vsyncpa [#allocation5], 0  ;;  %s16_s14 = sshll.u32 %s1132_s1, 4  ;;  %s1091_s15 = smov [#allocation3]   ;;  %s17_s14 = int_to_ptr.hbm [resolvable:$true] %s16_s14 }
   0x2   :  { %s18_s16 = sshll.u32 %s1091_s15, 4  ;;  %s1092_s17 = smov 64   ;;  %s19_s16 = int_to_ptr.vmem [resolvable:$true] %s18_s16 }
   0x3   :  { %s1093_s18 = smov 4  }
   0x4   :  { %24 = dma.hbm_to_vmem [thread:$0]  %s17_s14, 8192, %s19_s16, [#allocation4], %s1092_s17, %s1092_s17, %s1093_s18  }
   0x5   :  { %1087 = dma.done.wait [#allocation4], 8192  }
   0x6   :  { %1088 = vsyncadd [#allocation4], 4294959104  ;;  %v976_v0 = vld [vmem:[#allocation3 + $0x38] sm:$0xff]  ;;  %v975_v4 = vld [vmem:[#allocation3 + $0x30] sm:$0xff]  ;;  %s1095_s23 = smov [#allocation6]   ;;  %s703_s27 = sshll.u32 %s1134_s3, 4  ;;  %s704_s27 = int_to_ptr.hbm [resolvable:$true] %s703_s27 }
   0x7   :  { %v984_v1 = vld [vmem:[#allocation3 + $0x78] sm:$0xff]  ;;  %580 = vmatpush.bf16.msra.mxu0 %v976_v0  ;;  %v983_v5 = vld [vmem:[#allocation3 + $0x70] sm:$0xff]  ;;  %v974_v8 = vld [vmem:[#allocation3 + $0x28] sm:$0xff]  ;;  %s701_s24 = sshll.u32 %s1095_s23, 4  ;;  %s702_s24 = int_to_ptr.vmem [resolvable:$true] %s701_s24 }
   0x8   :  { %v992_v2 = vld [vmem:[#allocation3 + $0xb8] sm:$0xff]  ;;  %593 = vmatpush.bf16.msra.mxu1 %v984_v1  ;;  %v991_v6 = vld [vmem:[#allocation3 + $0xb0] sm:$0xff]  ;;  %v982_v9 = vld [vmem:[#allocation3 + $0x68] sm:$0xff] }
   0x9   :  { %v1000_v3 = vld [vmem:[#allocation3 + $0xf8] sm:$0xff]  ;;  %606 = vmatpush.bf16.msra.mxu2 %v992_v2  ;;  %v999_v7 = vld [vmem:[#allocation3 + $0xf0] sm:$0xff]  ;;  %v990_v10 = vld [vmem:[#allocation3 + $0xa8] sm:$0xff] }
   0xa   :  { %619 = vmatpush.bf16.msra.mxu3 %v1000_v3  ;;  %v998_v11 = vld [vmem:[#allocation3 + $0xe8] sm:$0xff]  ;;  %v973_v12 = vld [vmem:[#allocation3 + $0x20] sm:$0xff]  ;;  %v37_v16 = vld [vmem:[%s1131_s0] sm:$0xff] }
   0xb   :  { %581 = vmatpush.bf16.msra.mxu0 %v975_v4  ;;  %v981_v13 = vld [vmem:[#allocation3 + $0x60] sm:$0xff]  ;;  %v972_v17 = vld [vmem:[#allocation3 + $0x18] sm:$0xff]  ;;  %41 = vst [vmem:[#allocation1] ss:$4 sm:$0xff] %v37_v16  ;;  %v971_v21 = vld [vmem:[#allocation3 + $0x10] sm:$0xff] }
   0xc   :  { %594 = vmatpush.bf16.msra.mxu1 %v983_v5  ;;  %v989_v14 = vld [vmem:[#allocation3 + $0xa0] sm:$0xff]  ;;  %v980_v18 = vld [vmem:[#allocation3 + $0x58] sm:$0xff]  ;;  %v979_v22 = vld [vmem:[#allocation3 + $0x50] sm:$0xff] }
   0xd   :  { %607 = vmatpush.bf16.msra.mxu2 %v991_v6  ;;  %v997_v15 = vld [vmem:[#allocation3 + $0xe0] sm:$0xff]  ;;  %v988_v19 = vld [vmem:[#allocation3 + $0x98] sm:$0xff]  ;;  %v987_v23 = vld [vmem:[#allocation3 + $0x90] sm:$0xff] }
   0xe   :  { %620 = vmatpush.bf16.msra.mxu3 %v999_v7  ;;  %v996_v20 = vld [vmem:[#allocation3 + $0xd8] sm:$0xff]  ;;  %v995_v24 = vld [vmem:[#allocation3 + $0xd0] sm:$0xff]  ;;  %v970_v25 = vld [vmem:[#allocation3 + $0x8] sm:$0xff] }
   0xf   :  { %582 = vmatpush.bf16.msra.mxu0 %v974_v8  ;;  %v978_v26 = vld [vmem:[#allocation3 + $0x48] sm:$0xff]  ;;  %v38_v29 = vld [vmem:[%s1131_s0 + $0x8] sm:$0xff]  ;;  %v1007_v46 = vld [vmem:[#allocation3 + $0x130] sm:$0xff] }
  0x10   :  { %595 = vmatpush.bf16.msra.mxu1 %v982_v9  ;;  %v986_v27 = vld [vmem:[#allocation3 + $0x88] sm:$0xff]  ;;  %v969_v30 = vld [vmem:[#allocation3] sm:$0xff]  ;;  %43 = vst [vmem:[#allocation1 + $0x20] ss:$4 sm:$0xff] %v38_v29  ;;  %v1008_v34 = vld [vmem:[#allocation3 + $0x138] sm:$0xff] }
  0x11   :  { %608 = vmatpush.bf16.msra.mxu2 %v990_v10  ;;  %v994_v28 = vld [vmem:[#allocation3 + $0xc8] sm:$0xff]  ;;  %v977_v31 = vld [vmem:[#allocation3 + $0x40] sm:$0xff]  ;;  %v1016_v35 = vld [vmem:[#allocation3 + $0x178] sm:$0xff] }
  0x12   :  { %621 = vmatpush.bf16.msra.mxu3 %v998_v11  ;;  %v985_v32 = vld [vmem:[#allocation3 + $0x80] sm:$0xff]  ;;  %v44_v37 = vld.sshfl [vmem:[#allocation1] sm:$0xff pattern:$0x73625140]  ;;  %v1006_v50 = vld [vmem:[#allocation3 + $0x128] sm:$0xff] }
  0x13   :  { %583 = vmatpush.bf16.msra.mxu0 %v973_v12  ;;  %v993_v33 = vld [vmem:[#allocation3 + $0xc0] sm:$0xff]  ;;  %v47_v38 = vld.sshfl [vmem:[#allocation1 + $0x18] sm:$0xff pattern:$0x73625140]  ;;  %v1024_v40 = vld [vmem:[#allocation3 + $0x1b8] sm:$0xff]  ;;  %v60_v43 = vpack.c.bf16 %v44_v37, %v44_v37 }
  0x14   :  { %596 = vmatpush.bf16.msra.mxu1 %v981_v13  ;;  %v46_v36 = vld.sshfl [vmem:[#allocation1 + $0x10] sm:$0xff pattern:$0x73625140]  ;;  %v45_v39 = vld.sshfl [vmem:[#allocation1 + $0x8] sm:$0xff pattern:$0x73625140]  ;;  %v63_v44 = vpack.c.bf16 %v47_v38, %v47_v38 }
  0x15   :  { %609 = vmatpush.bf16.msra.mxu2 %v989_v14  ;;  %v1032_v41 = vld [vmem:[#allocation3 + $0x1f8] sm:$0xff]  ;;  %v62_v42 = vpack.c.bf16 %v46_v36, %v46_v36  ;;  %v61_v45 = vpack.c.bf16 %v45_v39, %v45_v39  ;;  %v1015_v47 = vld [vmem:[#allocation3 + $0x170] sm:$0xff]  ;;  %v1014_v51 = vld [vmem:[#allocation3 + $0x168] sm:$0xff] }
  0x16   :  { %622 = vmatpush.bf16.msra.mxu3 %v997_v15  ;;  %v1023_v48 = vld [vmem:[#allocation3 + $0x1b0] sm:$0xff]  ;;  %v1022_v52 = vld [vmem:[#allocation3 + $0x1a8] sm:$0xff]  ;;  %v1005_v54 = vld [vmem:[#allocation3 + $0x120] sm:$0xff] }
  0x17   :  { %584 = vmatpush.bf16.msra.mxu0 %v972_v17  ;;  %v1031_v49 = vld [vmem:[#allocation3 + $0x1f0] sm:$0xff]  ;;  %v1030_v53 = vld [vmem:[#allocation3 + $0x1e8] sm:$0xff]  ;;  %v1013_v55 = vld [vmem:[#allocation3 + $0x160] sm:$0xff] }
  0x18   :  { %597 = vmatpush.bf16.msra.mxu1 %v980_v18  ;;  %v1021_v56 = vld [vmem:[#allocation3 + $0x1a0] sm:$0xff]  ;;  %v1004_v58 = vld [vmem:[#allocation3 + $0x118] sm:$0xff]  ;;  %v1003_v62 = vld [vmem:[#allocation3 + $0x110] sm:$0xff] }
  0x19   :  { %610 = vmatpush.bf16.msra.mxu2 %v988_v19  ;;  %v1029_v57 = vld [vmem:[#allocation3 + $0x1e0] sm:$0xff]  ;;  %v1012_v59 = vld [vmem:[#allocation3 + $0x158] sm:$0xff]  ;;  %v1011_v63 = vld [vmem:[#allocation3 + $0x150] sm:$0xff] }
  0x1a   :  { %623 = vmatpush.bf16.msra.mxu3 %v996_v20  ;;  %v1020_v60 = vld [vmem:[#allocation3 + $0x198] sm:$0xff]  ;;  %v1019_v0 = vld [vmem:[#allocation3 + $0x190] sm:$0xff]  ;;  %v1002_v2 = vld [vmem:[#allocation3 + $0x108] sm:$0xff]  ;;  %v1094_v20 = vmov 0.0  }
  0x1b   :  { %585 = vmatpush.bf16.msra.mxu0 %v971_v21  ;;  %v1028_v61 = vld [vmem:[#allocation3 + $0x1d8] sm:$0xff]  ;;  %v1027_v1 = vld [vmem:[#allocation3 + $0x1d0] sm:$0xff]  ;;  %v1010_v3 = vld [vmem:[#allocation3 + $0x148] sm:$0xff]  ;;  %35 = vst [vmem:[#allocation2] sm:$0x3] %v1094_v20 }
  0x1c   :  { %598 = vmatpush.bf16.msra.mxu1 %v979_v22  ;;  %v1018_v4 = vld [vmem:[#allocation3 + $0x188] sm:$0xff]  ;;  %v1001_v6 = vld [vmem:[#allocation3 + $0x100] sm:$0xff]  ;;  %v48_v10 = vld.sshfl [vmem:[#allocation1 + $0x20] sm:$0xff pattern:$0x73625140] }
  0x1d   :  { %611 = vmatpush.bf16.msra.mxu2 %v987_v23  ;;  %v1026_v5 = vld [vmem:[#allocation3 + $0x1c8] sm:$0xff]  ;;  %v1009_v7 = vld [vmem:[#allocation3 + $0x140] sm:$0xff]  ;;  %v64_v14 = vpack.c.bf16 %v48_v10, %v48_v10 }
  0x1e   :  { %624 = vmatpush.bf16.msra.mxu3 %v995_v24  ;;  %v1017_v8 = vld [vmem:[#allocation3 + $0x180] sm:$0xff]  ;;  %v51_v13 = vld.sshfl [vmem:[#allocation1 + $0x38] sm:$0xff pattern:$0x73625140] }
  0x1f   :  { %586 = vmatpush.bf16.msra.mxu0 %v970_v25  ;;  %v1025_v9 = vld [vmem:[#allocation3 + $0x1c0] sm:$0xff]  ;;  %v67_v17 = vpack.c.bf16 %v51_v13, %v51_v13 }
  0x20   :  { %599 = vmatpush.bf16.msra.mxu1 %v978_v26  ;;  %v49_v11 = vld.sshfl [vmem:[#allocation1 + $0x28] sm:$0xff pattern:$0x73625140]  ;;  %v50_v12 = vld.sshfl [vmem:[#allocation1 + $0x30] sm:$0xff pattern:$0x73625140] }
  0x21   :  { %612 = vmatpush.bf16.msra.mxu2 %v986_v27  ;;  %v65_v15 = vpack.c.bf16 %v49_v11, %v49_v11  ;;  %v66_v16 = vpack.c.bf16 %v50_v12, %v50_v12 }
  0x22   :  { %625 = vmatpush.bf16.msra.mxu3 %v994_v28  ;;  %v36_v39 = vld [vmem:[#allocation2] sm:$0x3] }
  0x23   :  { %587 = vmatpush.bf16.msra.mxu0 %v969_v30 }
  0x24   :  { %600 = vmatpush.bf16.msra.mxu1 %v977_v31 }
  0x25   :  { %613 = vmatpush.bf16.msra.mxu2 %v985_v32 }
  0x26   :  { %626 = vmatpush.bf16.msra.mxu3 %v993_v33  ;;  %588 = vmatmul.bf16.vlgmr.msra.gmra.mxu0 %v60_v43 }
  0x27   :  { %632 = vmatpush.bf16.msrb.mxu0 %v1008_v34  ;;  %601 = vmatmul.bf16.vlgmr.msra.gmra.mxu1 %v61_v45 }
  0x28   :  { %645 = vmatpush.bf16.msrb.mxu1 %v1016_v35  ;;  %614 = vmatmul.bf16.vlgmr.msra.gmra.mxu2 %v62_v42 }
  0x29   :  { %658 = vmatpush.bf16.msrb.mxu2 %v1024_v40  ;;  %627 = vmatmul.bf16.vlgmr.msra.gmra.mxu3 %v63_v44  ;;  %v1038_v44 = vld [vmem:[%s1133_s2] ss:$0 sm:$0xff] }
  0x2a   :  { %671 = vmatpush.bf16.msrb.mxu3 %v1032_v41 }
  0x2b   :  { %633 = vmatpush.bf16.msrb.mxu0 %v1007_v46 }
  0x2c   :  { %646 = vmatpush.bf16.msrb.mxu1 %v1015_v47 }
  0x2d   :  { %659 = vmatpush.bf16.msrb.mxu2 %v1023_v48 }
  0x2e   :  { %672 = vmatpush.bf16.msrb.mxu3 %v1031_v49 }
  0x2f   :  { %634 = vmatpush.bf16.msrb.mxu0 %v1006_v50 }
  0x30   :  { %647 = vmatpush.bf16.msrb.mxu1 %v1014_v51 }
  0x31   :  { %660 = vmatpush.bf16.msrb.mxu2 %v1022_v52 }
  0x32   :  { %673 = vmatpush.bf16.msrb.mxu3 %v1030_v53 }
  0x33   :  { %635 = vmatpush.bf16.msrb.mxu0 %v1005_v54 }
  0x34   :  { %648 = vmatpush.bf16.msrb.mxu1 %v1013_v55 }
  0x35   :  { %661 = vmatpush.bf16.msrb.mxu2 %v1021_v56 }
  0x36   :  { %674 = vmatpush.bf16.msrb.mxu3 %v1029_v57 }
  0x37   :  { %636 = vmatpush.bf16.msrb.mxu0 %v1004_v58 }
  0x38   :  { %649 = vmatpush.bf16.msrb.mxu1 %v1012_v59 }
  0x39   :  { %662 = vmatpush.bf16.msrb.mxu2 %v1020_v60 }
  0x3a   :  { %675 = vmatpush.bf16.msrb.mxu3 %v1028_v61 }
  0x3b   :  { %637 = vmatpush.bf16.msrb.mxu0 %v1003_v62 }
  0x3c   :  { %650 = vmatpush.bf16.msrb.mxu1 %v1011_v63 }
  0x3d   :  { %663 = vmatpush.bf16.msrb.mxu2 %v1019_v0 }
  0x3e   :  { %676 = vmatpush.bf16.msrb.mxu3 %v1027_v1 }
  0x3f   :  { %638 = vmatpush.bf16.msrb.mxu0 %v1002_v2 }
  0x40   :  { %651 = vmatpush.bf16.msrb.mxu1 %v1010_v3 }
  0x41   :  { %664 = vmatpush.bf16.msrb.mxu2 %v1018_v4 }
  0x42   :  { %677 = vmatpush.bf16.msrb.mxu3 %v1026_v5 }
  0x43   :  { %639 = vmatpush.bf16.msrb.mxu0 %v1001_v6 }
  0x44   :  { %652 = vmatpush.bf16.msrb.mxu1 %v1009_v7 }
  0x45   :  { %665 = vmatpush.bf16.msrb.mxu2 %v1017_v8 }
  0x46   :  { %678 = vmatpush.bf16.msrb.mxu3 %v1025_v9  ;;  %640 = vmatmul.bf16.vlgmr.msrb.gmra.mxu0 %v64_v14 }
  0x47   :  { %653 = vmatmul.bf16.vlgmr.msrb.gmra.mxu1 %v65_v15 }
  0x48   :  { %666 = vmatmul.bf16.vlgmr.msrb.gmra.mxu2 %v66_v16 }
  0x49   :  { %679 = vmatmul.bf16.vlgmr.msrb.gmra.mxu3 %v67_v17 }
  0xa3   :  { %v589_v18 = vpop.f32.mrf.mxu0 }
  0xa4   :  { %v602_v19 = vpop.f32.mrf.mxu1 }
  0xa5   :  { %v603_v27 = vadd.f32 %v602_v19, %v589_v18 }
  0xab   :  { %v615_v21 = vpop.f32.mrf.mxu2  ;;  %v591_v23 = vpop.f32.mrf.mxu0 }
  0xac   :  { %v628_v22 = vpop.f32.mrf.mxu3  ;;  %v604_v24 = vpop.f32.mrf.mxu1  ;;  %v616_v28 = vadd.f32 %v615_v21, %v603_v27 }
  0xae   :  { %v629_v29 = vadd.f32 %v628_v22, %v616_v28 }
  0xb3   :  { %v617_v25 = vpop.f32.mrf.mxu2 }
  0xb4   :  { %v630_v26 = vpop.f32.mrf.mxu3 }
  0xc3   :  { %v641_v30 = vpop.f32.mrf.mxu0 }
  0xc4   :  { %v654_v31 = vpop.f32.mrf.mxu1  ;;  %v642_v32 = vadd.f32 %v641_v30, %v629_v29 }
  0xc6   :  { %v655_v33 = vadd.f32 %v654_v31, %v642_v32 }
  0xcb   :  { %v667_v34 = vpop.f32.mrf.mxu2  ;;  %v643_v37 = vpop.f32.mrf.mxu0 }
  0xcc   :  { %v680_v35 = vpop.f32.mrf.mxu3  ;;  %v668_v36 = vadd.f32 %v667_v34, %v655_v33  ;;  %v656_v38 = vpop.f32.mrf.mxu1 }
  0xce   :  { %v681_v40 = vadd.f32 %v680_v35, %v668_v36 }
  0xd0   :  { %v684_v41 = vadd.f32 %v681_v40, %v36_v39 }
  0xd2   :  { %685 = vst [vmem:[#allocation2] sm:$0x3] %v684_v41 }
  0xd3   :  { %v669_v42 = vpop.f32.mrf.mxu2 }
  0xd4   :  { %v682_v43 = vpop.f32.mrf.mxu3 }
  0xd9   :  { %v689_v45 = vld [vmem:[#allocation2] sm:$0x3] }
  0xda   :  { %v694_v46 = vadd.f32 %v1038_v44, %v689_v45 }
  0xdc   :  { %695 = vst [vmem:[#allocation6] sm:$0x3] %v694_v46 }
  0xdd   :  { %706 = dma.vmem_to_hbm [thread:$0]  %s702_s24, 32, %s704_s27, [#allocation5]  }
  0xde   :  { %1089 = dma.done.wait [#allocation5], 32  }
  0xdf   :  { %1090 = vsyncadd [#allocation5], 4294967264 }
  0xe0   :  { %711 = vsyncpa [#allocation4], 1 }
  0xe1   :  { %712 = vsyncpa [#allocation5], 1 }

</bundles_post_ra>
